<compile_context>
chip_gen: v7x
topology: tpu7x:2x2x1
jax: 0.10.0
libtpu: 0.0.40
codegen_flags: <defaults>
</compile_context>

<pallas_src>
import functools
import math

import jax
import jax.numpy as jnp
import numpy as np
from jax.experimental import pallas as pl
from jax.experimental.pallas import tpu as pltpu

# Column layout of the packed (C, 8) per-channel parameter array.
_WP, _WC, _WN, _BN_S, _BN_B = 0, 1, 2, 3, 4


def _res2tsm_kernel(x_ref, p_ref, o_ref, y_ref, *, fold, width, scale, T, F):
    """One batch sample.

    x_ref: (C, T*F)      input activations (math runs in f32 regardless of dtype)
    p_ref: (C, 8)  f32   packed per-channel params [wp, wc, wn, bn_scale, bn_bias]
    o_ref: (C, T*F)      output
    y_ref: (width, T*F) f32 VMEM scratch carrying the res2net running `y`
    """
    TF = T * F
    f32 = jnp.float32

    # Hoisted boundary masks for the two temporal shifts (computed once).
    lane = jax.lax.broadcasted_iota(jnp.int32, (1, TF), 1)
    m_next = (lane < (TF - F)).astype(f32)   # t+1 exists
    m_prev = (lane >= F).astype(f32)         # t-1 exists

    def shift_next(v):   # out[t, f] = v[t+1, f], zero at t = T-1
        return pltpu.roll(v, shift=TF - F, axis=1) * m_next

    def shift_prev(v):   # out[t, f] = v[t-1, f], zero at t = 0
        return pltpu.roll(v, shift=F, axis=1) * m_prev

    def load(a, b):
        return x_ref[a:b, :].astype(f32)

    def shifted_pieces(i):
        # TemporalShift of channels [i*width, (i+1)*width) as (offset, value)
        # pieces from the STATIC intersections with the three shift groups;
        # identity channels do zero shift work.
        g0, g1 = i * width, (i + 1) * width
        pieces = []
        a, b = g0, min(g1, fold)                   # [0, fold):      t -> t+1
        if a < b:
            pieces.append((a - g0, shift_next(load(a, b))))
        a, b = max(g0, fold), min(g1, 2 * fold)    # [fold, 2*fold): t -> t-1
        if a < b:
            pieces.append((a - g0, shift_prev(load(a, b))))
        a, b = max(g0, 2 * fold), g1               # [2*fold, C):    identity
        if a < b:
            pieces.append((a - g0, load(a, b)))
        return pieces

    def bn_relu(v, g0, g1):
        return jnp.maximum(v * p_ref[g0:g1, _BN_S:_BN_S + 1]
                           + p_ref[g0:g1, _BN_B:_BN_B + 1], 0.0)

    # --- group 0: assemble shifted slab piecewise into the y scratch (no
    # sublane concat), then one full-width lane-dense store ------------------
    for off, v in shifted_pieces(0):
        y_ref[off:off + v.shape[0], :] = v
    o_ref[0:width, :] = bn_relu(y_ref[...], 0, width).astype(o_ref.dtype)

    # --- groups 1..scale-1: sp = dwconv_T(shifted_i + y); y = sp ------------
    for i in range(1, scale):
        g0, g1 = i * width, (i + 1) * width
        pieces = shifted_pieces(i)
        shifted = (pieces[0][1] if len(pieces) == 1
                   else jnp.concatenate([p[1] for p in pieces], axis=0))
        sp = shifted + y_ref[...]
        # Depthwise 3-tap conv along T (cross-correlation, pad=1):
        #   out[t] = w0*in[t-1] + w1*in[t] + w2*in[t+1]
        sp = (p_ref[g0:g1, _WP:_WP + 1] * shift_prev(sp)
              + p_ref[g0:g1, _WC:_WC + 1] * sp
              + p_ref[g0:g1, _WN:_WN + 1] * shift_next(sp))
        y_ref[...] = sp
        o_ref[g0:g1, :] = bn_relu(sp, g0, g1).astype(o_ref.dtype)


def res2tsm_block(x, conv_w, bn_gamma, bn_beta, bn_mean, bn_var, *,
                  scale=4, shift_div=8, eps=1e-5):
    """Fused Res2TSMBlock forward.

    x:       (B, C, T, F)        f32 or bf16 activations
    conv_w:  (scale-1, width, 3) taps [t-1, t, t+1] per depthwise channel
    bn_*:    (C,)                BatchNorm2d params / running stats (inference)
    """
    B, C, T, F = x.shape
    assert C % scale == 0, "channels must be divisible by scale"
    width = C // scale
    fold = C // shift_div
    dt = x.dtype
    f32 = jnp.float32

    # Lane-dense last dim: pad F so the flattened T*Fp is a multiple of 128.
    lane_q = 128 // math.gcd(T, 128)
    Fp = ((F + lane_q - 1) // lane_q) * lane_q
    if Fp != F:
        x = jnp.pad(x, ((0, 0), (0, 0), (0, 0), (0, Fp - F)))
    TF = T * Fp

    # Fold BatchNorm (inference) into per-channel scale/bias, kept in f32.
    inv = bn_gamma.astype(f32) / jnp.sqrt(bn_var.astype(f32) + eps)
    bn_s = inv
    bn_b = bn_beta.astype(f32) - bn_mean.astype(f32) * inv

    # Per-absolute-channel conv taps; group 0 has no conv (rows stay zero).
    def scatter_taps(k):
        return jnp.zeros((C,), f32).at[width:].set(
            conv_w[:, :, k].reshape(-1).astype(f32))

    params = jnp.zeros((C, 8), f32)
    params = params.at[:, _WP].set(scatter_taps(0))
    params = params.at[:, _WC].set(scatter_taps(1))
    params = params.at[:, _WN].set(scatter_taps(2))
    params = params.at[:, _BN_S].set(bn_s)
    params = params.at[:, _BN_B].set(bn_b)

    x2 = x.reshape(B, C, TF)   # free contiguous reshape -> lane-dense last dim

    itemsize = jnp.dtype(dt).itemsize
    block_bytes = C * TF * itemsize
    # 2x double-buffered (in + out) whole-sample blocks + params + y scratch.
    need = 4 * block_bytes + 2 * C * 128 * 4 + width * TF * 4
    vmem_limit = int(min(max(2 * need + (4 << 20), 32 << 20), 64 << 20))

    cost = pl.CostEstimate(
        flops=9 * B * (C - width) * TF + 3 * B * width * TF,
        transcendentals=0,
        bytes_accessed=2 * B * C * TF * itemsize + C * 8 * 4,
    )

    kernel = functools.partial(_res2tsm_kernel, fold=fold, width=width,
                               scale=scale, T=T, F=Fp)

    out = pl.pallas_call(
        kernel,
        out_shape=jax.ShapeDtypeStruct((B, C, TF), dt),
        grid_spec=pltpu.PrefetchScalarGridSpec(
            num_scalar_prefetch=0,
            grid=(B,),
            in_specs=[
                pl.BlockSpec((None, C, TF), lambda bb: (bb, 0, 0)),
                pl.BlockSpec((C, 8), lambda bb: (0, 0)),
            ],
            out_specs=pl.BlockSpec((None, C, TF), lambda bb: (bb, 0, 0)),
            scratch_shapes=[pltpu.VMEM((width, TF), f32)],
        ),
        compiler_params=pltpu.CompilerParams(
            dimension_semantics=("parallel",),
            vmem_limit_bytes=vmem_limit,
        ),
        cost_estimate=cost,
    )(x2, params)

    out = out.reshape(B, C, T, Fp)
    if Fp != F:
        out = out[:, :, :, :F]
    return out


def res2tsm_ref(x, conv_w, bn_gamma, bn_beta, bn_mean, bn_var, *,
                scale=4, shift_div=8, eps=1e-5):
    """Pure-JAX reference mirroring the PyTorch Res2TSMBlock forward."""
    B, C, T, F = x.shape
    width = C // scale
    fold = C // shift_div

    shifted = jnp.zeros_like(x)
    shifted = shifted.at[:, :fold, :-1, :].set(x[:, :fold, 1:, :])
    shifted = shifted.at[:, fold:2 * fold, 1:, :].set(x[:, fold:2 * fold, :-1, :])
    shifted = shifted.at[:, 2 * fold:, :, :].set(x[:, 2 * fold:, :, :])

    def dwconv(v, w):  # v: (B, width, T, F), w: (width, 3); pad=1 along T
        vp = jnp.pad(v, ((0, 0), (0, 0), (1, 1), (0, 0)))
        return (w[None, :, 0, None, None] * vp[:, :, 0:T, :]
                + w[None, :, 1, None, None] * vp[:, :, 1:T + 1, :]
                + w[None, :, 2, None, None] * vp[:, :, 2:T + 2, :])

    y = shifted[:, :width]
    outs = [y]
    for i in range(1, scale):
        sp = shifted[:, i * width:(i + 1) * width] + y
        sp = dwconv(sp, conv_w[i - 1])
        y = sp
        outs.append(sp)
    out = jnp.concatenate(outs, axis=1)

    inv = bn_gamma / jnp.sqrt(bn_var + eps)
    out = (out - bn_mean[None, :, None, None]) * inv[None, :, None, None] \
          + bn_beta[None, :, None, None]
    return jnp.maximum(out, 0.0)


if __name__ == "__main__":
    key = jax.random.PRNGKey(0)
    # Sublane/lane-aligned demo shapes: width=16, fold=8, T*F=128.
    B, C, T, F = 2, 64, 8, 16
    scale, shift_div = 4, 8
    width = C // scale

    ks = jax.random.split(key, 6)
    x = jax.random.normal(ks[0], (B, C, T, F), dtype=jnp.float32)
    conv_w = 0.5 * jax.random.normal(ks[1], (scale - 1, width, 3),
                                     dtype=jnp.float32)
    bn_gamma = 1.0 + 0.1 * jax.random.normal(ks[2], (C,), dtype=jnp.float32)
    bn_beta = 0.1 * jax.random.normal(ks[3], (C,), dtype=jnp.float32)
    bn_mean = 0.1 * jax.random.normal(ks[4], (C,), dtype=jnp.float32)
    bn_var = jax.random.uniform(ks[5], (C,), minval=0.5, maxval=1.5,
                                dtype=jnp.float32)

    # f32 path: exact check against the pure-JAX reference.
    out = res2tsm_block(x, conv_w, bn_gamma, bn_beta, bn_mean, bn_var,
                        scale=scale, shift_div=shift_div)
    out = jax.block_until_ready(out)
    ref = res2tsm_ref(x, conv_w, bn_gamma, bn_beta, bn_mean, bn_var,
                      scale=scale, shift_div=shift_div)
    np.testing.assert_allclose(np.asarray(out), np.asarray(ref),
                               rtol=1e-5, atol=1e-5)

    # bf16 I/O path (f32 math inside the kernel): compare against the f32
    # reference evaluated on the bf16-rounded input.
    x_bf = x.astype(jnp.bfloat16)
    out_bf = res2tsm_block(x_bf, conv_w, bn_gamma, bn_beta, bn_mean, bn_var,
                           scale=scale, shift_div=shift_div)
    out_bf = jax.block_until_ready(out_bf)
    ref_bf = res2tsm_ref(x_bf.astype(jnp.float32), conv_w, bn_gamma, bn_beta,
                         bn_mean, bn_var, scale=scale, shift_div=shift_div)
    np.testing.assert_allclose(np.asarray(out_bf.astype(jnp.float32)),
                               np.asarray(ref_bf), rtol=2e-2, atol=2e-2)

    print("KERNEL_OK")
</pallas_src>

<mosaic_0001>
module attributes {stable_mosaic.version = 11 : i64} {
  func.func @_res2tsm_kernel(%arg0: i32, %arg1: memref<1x64x128xf32, #tpu.memory_space<vmem>>, %arg2: memref<64x8xf32, #tpu.memory_space<vmem>>, %arg3: memref<1x64x128xf32, #tpu.memory_space<vmem>>, %arg4: memref<16x128xf32, #tpu.memory_space<vmem>>) attributes {dimension_semantics = [#tpu.dimension_semantics<parallel>], iteration_bounds = array<i64: 2>, scalar_prefetch = 0 : i64, scratch_operands = 1 : i64, tpu.core_type = #tpu.core_type<tc>, window_params = [{transform_indices = @transform_0, window_bounds = array<i64: 1, 64, 128>}, {pipeline_mode = #tpu.pipeline_mode<synchronous>, transform_indices = @transform_1, window_bounds = array<i64: 64, 8>}, {transform_indices = @transform_2, window_bounds = array<i64: 1, 64, 128>}]} {
    %0 = tpu.iota {dimensions = array<i32: 1>} : vector<1x128xi32>
    %c112_i32 = arith.constant 112 : i32
    %1 = vector.broadcast %c112_i32 : i32 to vector<1x128xi32>
    %2 = arith.cmpi slt, %0, %1 : vector<1x128xi32>
    %3 = arith.extui %2 : vector<1x128xi1> to vector<1x128xi32>
    %4 = arith.sitofp %3 : vector<1x128xi32> to vector<1x128xf32>
    %c16_i32 = arith.constant 16 : i32
    %5 = vector.broadcast %c16_i32 : i32 to vector<1x128xi32>
    %6 = arith.cmpi sge, %0, %5 : vector<1x128xi32>
    %7 = arith.extui %6 : vector<1x128xi1> to vector<1x128xi32>
    %8 = arith.sitofp %7 : vector<1x128xi32> to vector<1x128xf32>
    %c0 = arith.constant 0 : index
    %c0_0 = arith.constant 0 : index
    %c0_1 = arith.constant 0 : index
    %9 = vector.load %arg1[%c0, %c0_0, %c0_1] : memref<1x64x128xf32, #tpu.memory_space<vmem>>, vector<1x8x128xf32>
    %10 = vector.shape_cast %9 : vector<1x8x128xf32> to vector<8x128xf32>
    %c112_i32_2 = arith.constant 112 : i32
    %11 = tpu.dynamic_rotate %10 by %c112_i32_2 dim 1 : vector<8x128xf32>, i32 -> vector<8x128xf32>
    %12 = vector.broadcast %4 : vector<1x128xf32> to vector<8x128xf32>
    %13 = arith.mulf %11, %12 : vector<8x128xf32>
    %c0_3 = arith.constant 0 : index
    %c8 = arith.constant 8 : index
    %c0_4 = arith.constant 0 : index
    %14 = vector.load %arg1[%c0_3, %c8, %c0_4] : memref<1x64x128xf32, #tpu.memory_space<vmem>>, vector<1x8x128xf32>
    %15 = vector.shape_cast %14 : vector<1x8x128xf32> to vector<8x128xf32>
    %c16_i32_5 = arith.constant 16 : i32
    %16 = tpu.dynamic_rotate %15 by %c16_i32_5 dim 1 : vector<8x128xf32>, i32 -> vector<8x128xf32>
    %17 = vector.broadcast %8 : vector<1x128xf32> to vector<8x128xf32>
    %18 = arith.mulf %16, %17 : vector<8x128xf32>
    %c0_6 = arith.constant 0 : index
    %c0_7 = arith.constant 0 : index
    %19 = vector.load %arg4[%c0_6, %c0_7] : memref<16x128xf32, #tpu.memory_space<vmem>>, vector<8x128xf32>
    tpu.vector_store %arg4[%c0_6, %c0_7], %13 {strides = array<i32>} : memref<16x128xf32, #tpu.memory_space<vmem>>, vector<8x128xf32>,
    %c8_8 = arith.constant 8 : index
    %c0_9 = arith.constant 0 : index
    %20 = vector.load %arg4[%c8_8, %c0_9] : memref<16x128xf32, #tpu.memory_space<vmem>>, vector<8x128xf32>
    tpu.vector_store %arg4[%c8_8, %c0_9], %18 {strides = array<i32>} : memref<16x128xf32, #tpu.memory_space<vmem>>, vector<8x128xf32>,
    %c0_10 = arith.constant 0 : index
    %c0_11 = arith.constant 0 : index
    %21 = vector.load %arg4[%c0_10, %c0_11] : memref<16x128xf32, #tpu.memory_space<vmem>>, vector<16x128xf32>
    %c0_12 = arith.constant 0 : index
    %c3 = arith.constant 3 : index
    %22 = vector.load %arg2[%c0_12, %c3] : memref<64x8xf32, #tpu.memory_space<vmem>>, vector<16x1xf32>
    %23 = vector.broadcast %22 : vector<16x1xf32> to vector<16x128xf32>
    %24 = arith.mulf %21, %23 : vector<16x128xf32>
    %c0_13 = arith.constant 0 : index
    %c4 = arith.constant 4 : index
    %25 = vector.load %arg2[%c0_13, %c4] : memref<64x8xf32, #tpu.memory_space<vmem>>, vector<16x1xf32>
    %26 = vector.broadcast %25 : vector<16x1xf32> to vector<16x128xf32>
    %27 = arith.addf %24, %26 : vector<16x128xf32>
    %cst = arith.constant 0.000000e+00 : f32
    %28 = vector.broadcast %cst : f32 to vector<16x128xf32>
    %29 = arith.maximumf %27, %28 : vector<16x128xf32>
    %c0_14 = arith.constant 0 : index
    %c0_15 = arith.constant 0 : index
    %c0_16 = arith.constant 0 : index
    %30 = vector.load %arg3[%c0_14, %c0_15, %c0_16] : memref<1x64x128xf32, #tpu.memory_space<vmem>>, vector<1x16x128xf32>
    %31 = vector.shape_cast %30 : vector<1x16x128xf32> to vector<16x128xf32>
    %32 = vector.shape_cast %29 : vector<16x128xf32> to vector<1x16x128xf32>
    tpu.vector_store %arg3[%c0_14, %c0_15, %c0_16], %32 {strides = array<i32>} : memref<1x64x128xf32, #tpu.memory_space<vmem>>, vector<1x16x128xf32>,
    %c0_17 = arith.constant 0 : index
    %c16 = arith.constant 16 : index
    %c0_18 = arith.constant 0 : index
    %33 = vector.load %arg1[%c0_17, %c16, %c0_18] : memref<1x64x128xf32, #tpu.memory_space<vmem>>, vector<1x16x128xf32>
    %34 = vector.shape_cast %33 : vector<1x16x128xf32> to vector<16x128xf32>
    %c0_19 = arith.constant 0 : index
    %c0_20 = arith.constant 0 : index
    %35 = vector.load %arg4[%c0_19, %c0_20] : memref<16x128xf32, #tpu.memory_space<vmem>>, vector<16x128xf32>
    %36 = arith.addf %34, %35 : vector<16x128xf32>
    %c16_21 = arith.constant 16 : index
    %c0_22 = arith.constant 0 : index
    %37 = vector.load %arg2[%c16_21, %c0_22] : memref<64x8xf32, #tpu.memory_space<vmem>>, vector<16x1xf32>
    %c16_i32_23 = arith.constant 16 : i32
    %38 = tpu.dynamic_rotate %36 by %c16_i32_23 dim 1 : vector<16x128xf32>, i32 -> vector<16x128xf32>
    %39 = vector.broadcast %8 : vector<1x128xf32> to vector<16x128xf32>
    %40 = arith.mulf %38, %39 : vector<16x128xf32>
    %41 = vector.broadcast %37 : vector<16x1xf32> to vector<16x128xf32>
    %42 = arith.mulf %41, %40 : vector<16x128xf32>
    %c16_24 = arith.constant 16 : index
    %c1 = arith.constant 1 : index
    %43 = vector.load %arg2[%c16_24, %c1] : memref<64x8xf32, #tpu.memory_space<vmem>>, vector<16x1xf32>
    %44 = vector.broadcast %43 : vector<16x1xf32> to vector<16x128xf32>
    %45 = arith.mulf %44, %36 : vector<16x128xf32>
    %46 = arith.addf %42, %45 : vector<16x128xf32>
    %c16_25 = arith.constant 16 : index
    %c2 = arith.constant 2 : index
    %47 = vector.load %arg2[%c16_25, %c2] : memref<64x8xf32, #tpu.memory_space<vmem>>, vector<16x1xf32>
    %c112_i32_26 = arith.constant 112 : i32
    %48 = tpu.dynamic_rotate %36 by %c112_i32_26 dim 1 : vector<16x128xf32>, i32 -> vector<16x128xf32>
    %49 = vector.broadcast %4 : vector<1x128xf32> to vector<16x128xf32>
    %50 = arith.mulf %48, %49 : vector<16x128xf32>
    %51 = vector.broadcast %47 : vector<16x1xf32> to vector<16x128xf32>
    %52 = arith.mulf %51, %50 : vector<16x128xf32>
    %53 = arith.addf %46, %52 : vector<16x128xf32>
    %c0_27 = arith.constant 0 : index
    %c0_28 = arith.constant 0 : index
    %54 = vector.load %arg4[%c0_27, %c0_28] : memref<16x128xf32, #tpu.memory_space<vmem>>, vector<16x128xf32>
    tpu.vector_store %arg4[%c0_27, %c0_28], %53 {strides = array<i32>} : memref<16x128xf32, #tpu.memory_space<vmem>>, vector<16x128xf32>,
    %c16_29 = arith.constant 16 : index
    %c3_30 = arith.constant 3 : index
    %55 = vector.load %arg2[%c16_29, %c3_30] : memref<64x8xf32, #tpu.memory_space<vmem>>, vector<16x1xf32>
    %56 = vector.broadcast %55 : vector<16x1xf32> to vector<16x128xf32>
    %57 = arith.mulf %53, %56 : vector<16x128xf32>
    %c16_31 = arith.constant 16 : index
    %c4_32 = arith.constant 4 : index
    %58 = vector.load %arg2[%c16_31, %c4_32] : memref<64x8xf32, #tpu.memory_space<vmem>>, vector<16x1xf32>
    %59 = vector.broadcast %58 : vector<16x1xf32> to vector<16x128xf32>
    %60 = arith.addf %57, %59 : vector<16x128xf32>
    %cst_33 = arith.constant 0.000000e+00 : f32
    %61 = vector.broadcast %cst_33 : f32 to vector<16x128xf32>
    %62 = arith.maximumf %60, %61 : vector<16x128xf32>
    %c0_34 = arith.constant 0 : index
    %c16_35 = arith.constant 16 : index
    %c0_36 = arith.constant 0 : index
    %63 = vector.load %arg3[%c0_34, %c16_35, %c0_36] : memref<1x64x128xf32, #tpu.memory_space<vmem>>, vector<1x16x128xf32>
    %64 = vector.shape_cast %63 : vector<1x16x128xf32> to vector<16x128xf32>
    %65 = vector.shape_cast %62 : vector<16x128xf32> to vector<1x16x128xf32>
    tpu.vector_store %arg3[%c0_34, %c16_35, %c0_36], %65 {strides = array<i32>} : memref<1x64x128xf32, #tpu.memory_space<vmem>>, vector<1x16x128xf32>,
    %c0_37 = arith.constant 0 : index
    %c32 = arith.constant 32 : index
    %c0_38 = arith.constant 0 : index
    %66 = vector.load %arg1[%c0_37, %c32, %c0_38] : memref<1x64x128xf32, #tpu.memory_space<vmem>>, vector<1x16x128xf32>
    %67 = vector.shape_cast %66 : vector<1x16x128xf32> to vector<16x128xf32>
    %c0_39 = arith.constant 0 : index
    %c0_40 = arith.constant 0 : index
    %68 = vector.load %arg4[%c0_39, %c0_40] : memref<16x128xf32, #tpu.memory_space<vmem>>, vector<16x128xf32>
    %69 = arith.addf %67, %68 : vector<16x128xf32>
    %c32_41 = arith.constant 32 : index
    %c0_42 = arith.constant 0 : index
    %70 = vector.load %arg2[%c32_41, %c0_42] : memref<64x8xf32, #tpu.memory_space<vmem>>, vector<16x1xf32>
    %c16_i32_43 = arith.constant 16 : i32
    %71 = tpu.dynamic_rotate %69 by %c16_i32_43 dim 1 : vector<16x128xf32>, i32 -> vector<16x128xf32>
    %72 = vector.broadcast %8 : vector<1x128xf32> to vector<16x128xf32>
    %73 = arith.mulf %71, %72 : vector<16x128xf32>
    %74 = vector.broadcast %70 : vector<16x1xf32> to vector<16x128xf32>
    %75 = arith.mulf %74, %73 : vector<16x128xf32>
    %c32_44 = arith.constant 32 : index
    %c1_45 = arith.constant 1 : index
    %76 = vector.load %arg2[%c32_44, %c1_45] : memref<64x8xf32, #tpu.memory_space<vmem>>, vector<16x1xf32>
    %77 = vector.broadcast %76 : vector<16x1xf32> to vector<16x128xf32>
    %78 = arith.mulf %77, %69 : vector<16x128xf32>
    %79 = arith.addf %75, %78 : vector<16x128xf32>
    %c32_46 = arith.constant 32 : index
    %c2_47 = arith.constant 2 : index
    %80 = vector.load %arg2[%c32_46, %c2_47] : memref<64x8xf32, #tpu.memory_space<vmem>>, vector<16x1xf32>
    %c112_i32_48 = arith.constant 112 : i32
    %81 = tpu.dynamic_rotate %69 by %c112_i32_48 dim 1 : vector<16x128xf32>, i32 -> vector<16x128xf32>
    %82 = vector.broadcast %4 : vector<1x128xf32> to vector<16x128xf32>
    %83 = arith.mulf %81, %82 : vector<16x128xf32>
    %84 = vector.broadcast %80 : vector<16x1xf32> to vector<16x128xf32>
    %85 = arith.mulf %84, %83 : vector<16x128xf32>
    %86 = arith.addf %79, %85 : vector<16x128xf32>
    %c0_49 = arith.constant 0 : index
    %c0_50 = arith.constant 0 : index
    %87 = vector.load %arg4[%c0_49, %c0_50] : memref<16x128xf32, #tpu.memory_space<vmem>>, vector<16x128xf32>
    tpu.vector_store %arg4[%c0_49, %c0_50], %86 {strides = array<i32>} : memref<16x128xf32, #tpu.memory_space<vmem>>, vector<16x128xf32>,
    %c32_51 = arith.constant 32 : index
    %c3_52 = arith.constant 3 : index
    %88 = vector.load %arg2[%c32_51, %c3_52] : memref<64x8xf32, #tpu.memory_space<vmem>>, vector<16x1xf32>
    %89 = vector.broadcast %88 : vector<16x1xf32> to vector<16x128xf32>
    %90 = arith.mulf %86, %89 : vector<16x128xf32>
    %c32_53 = arith.constant 32 : index
    %c4_54 = arith.constant 4 : index
    %91 = vector.load %arg2[%c32_53, %c4_54] : memref<64x8xf32, #tpu.memory_space<vmem>>, vector<16x1xf32>
    %92 = vector.broadcast %91 : vector<16x1xf32> to vector<16x128xf32>
    %93 = arith.addf %90, %92 : vector<16x128xf32>
    %cst_55 = arith.constant 0.000000e+00 : f32
    %94 = vector.broadcast %cst_55 : f32 to vector<16x128xf32>
    %95 = arith.maximumf %93, %94 : vector<16x128xf32>
    %c0_56 = arith.constant 0 : index
    %c32_57 = arith.constant 32 : index
    %c0_58 = arith.constant 0 : index
    %96 = vector.load %arg3[%c0_56, %c32_57, %c0_58] : memref<1x64x128xf32, #tpu.memory_space<vmem>>, vector<1x16x128xf32>
    %97 = vector.shape_cast %96 : vector<1x16x128xf32> to vector<16x128xf32>
    %98 = vector.shape_cast %95 : vector<16x128xf32> to vector<1x16x128xf32>
    tpu.vector_store %arg3[%c0_56, %c32_57, %c0_58], %98 {strides = array<i32>} : memref<1x64x128xf32, #tpu.memory_space<vmem>>, vector<1x16x128xf32>,
    %c0_59 = arith.constant 0 : index
    %c48 = arith.constant 48 : index
    %c0_60 = arith.constant 0 : index
    %99 = vector.load %arg1[%c0_59, %c48, %c0_60] : memref<1x64x128xf32, #tpu.memory_space<vmem>>, vector<1x16x128xf32>
    %100 = vector.shape_cast %99 : vector<1x16x128xf32> to vector<16x128xf32>
    %c0_61 = arith.constant 0 : index
    %c0_62 = arith.constant 0 : index
    %101 = vector.load %arg4[%c0_61, %c0_62] : memref<16x128xf32, #tpu.memory_space<vmem>>, vector<16x128xf32>
    %102 = arith.addf %100, %101 : vector<16x128xf32>
    %c48_63 = arith.constant 48 : index
    %c0_64 = arith.constant 0 : index
    %103 = vector.load %arg2[%c48_63, %c0_64] : memref<64x8xf32, #tpu.memory_space<vmem>>, vector<16x1xf32>
    %c16_i32_65 = arith.constant 16 : i32
    %104 = tpu.dynamic_rotate %102 by %c16_i32_65 dim 1 : vector<16x128xf32>, i32 -> vector<16x128xf32>
    %105 = vector.broadcast %8 : vector<1x128xf32> to vector<16x128xf32>
    %106 = arith.mulf %104, %105 : vector<16x128xf32>
    %107 = vector.broadcast %103 : vector<16x1xf32> to vector<16x128xf32>
    %108 = arith.mulf %107, %106 : vector<16x128xf32>
    %c48_66 = arith.constant 48 : index
    %c1_67 = arith.constant 1 : index
    %109 = vector.load %arg2[%c48_66, %c1_67] : memref<64x8xf32, #tpu.memory_space<vmem>>, vector<16x1xf32>
    %110 = vector.broadcast %109 : vector<16x1xf32> to vector<16x128xf32>
    %111 = arith.mulf %110, %102 : vector<16x128xf32>
    %112 = arith.addf %108, %111 : vector<16x128xf32>
    %c48_68 = arith.constant 48 : index
    %c2_69 = arith.constant 2 : index
    %113 = vector.load %arg2[%c48_68, %c2_69] : memref<64x8xf32, #tpu.memory_space<vmem>>, vector<16x1xf32>
    %c112_i32_70 = arith.constant 112 : i32
    %114 = tpu.dynamic_rotate %102 by %c112_i32_70 dim 1 : vector<16x128xf32>, i32 -> vector<16x128xf32>
    %115 = vector.broadcast %4 : vector<1x128xf32> to vector<16x128xf32>
    %116 = arith.mulf %114, %115 : vector<16x128xf32>
    %117 = vector.broadcast %113 : vector<16x1xf32> to vector<16x128xf32>
    %118 = arith.mulf %117, %116 : vector<16x128xf32>
    %119 = arith.addf %112, %118 : vector<16x128xf32>
    %c0_71 = arith.constant 0 : index
    %c0_72 = arith.constant 0 : index
    %120 = vector.load %arg4[%c0_71, %c0_72] : memref<16x128xf32, #tpu.memory_space<vmem>>, vector<16x128xf32>
    tpu.vector_store %arg4[%c0_71, %c0_72], %119 {strides = array<i32>} : memref<16x128xf32, #tpu.memory_space<vmem>>, vector<16x128xf32>,
    %c48_73 = arith.constant 48 : index
    %c3_74 = arith.constant 3 : index
    %121 = vector.load %arg2[%c48_73, %c3_74] : memref<64x8xf32, #tpu.memory_space<vmem>>, vector<16x1xf32>
    %122 = vector.broadcast %121 : vector<16x1xf32> to vector<16x128xf32>
    %123 = arith.mulf %119, %122 : vector<16x128xf32>
    %c48_75 = arith.constant 48 : index
    %c4_76 = arith.constant 4 : index
    %124 = vector.load %arg2[%c48_75, %c4_76] : memref<64x8xf32, #tpu.memory_space<vmem>>, vector<16x1xf32>
    %125 = vector.broadcast %124 : vector<16x1xf32> to vector<16x128xf32>
    %126 = arith.addf %123, %125 : vector<16x128xf32>
    %cst_77 = arith.constant 0.000000e+00 : f32
    %127 = vector.broadcast %cst_77 : f32 to vector<16x128xf32>
    %128 = arith.maximumf %126, %127 : vector<16x128xf32>
    %c0_78 = arith.constant 0 : index
    %c48_79 = arith.constant 48 : index
    %c0_80 = arith.constant 0 : index
    %129 = vector.load %arg3[%c0_78, %c48_79, %c0_80] : memref<1x64x128xf32, #tpu.memory_space<vmem>>, vector<1x16x128xf32>
    %130 = vector.shape_cast %129 : vector<1x16x128xf32> to vector<16x128xf32>
    %131 = vector.shape_cast %128 : vector<16x128xf32> to vector<1x16x128xf32>
    tpu.vector_store %arg3[%c0_78, %c48_79, %c0_80], %131 {strides = array<i32>} : memref<1x64x128xf32, #tpu.memory_space<vmem>>, vector<1x16x128xf32>,
    return
  }
  func.func @transform_0(%arg0: i32) -> (i32, i32, i32) {
    %c0_i32 = arith.constant 0 : i32
    %c0_i32_0 = arith.constant 0 : i32
    %c0_i32_1 = arith.constant 0 : i32
    return %arg0, %c0_i32, %c0_i32_0 : i32, i32, i32
  }
  func.func @transform_1(%arg0: i32) -> (i32, i32) {
    %c0_i32 = arith.constant 0 : i32
    %c0_i32_0 = arith.constant 0 : i32
    %c0_i32_1 = arith.constant 0 : i32
    return %c0_i32, %c0_i32_0 : i32, i32
  }
  func.func @transform_2(%arg0: i32) -> (i32, i32, i32) {
    %c0_i32 = arith.constant 0 : i32
    %c0_i32_0 = arith.constant 0 : i32
    %c0_i32_1 = arith.constant 0 : i32
    return %arg0, %c0_i32, %c0_i32_0 : i32, i32, i32
  }
}

</mosaic_0001>

<bundles_post_ra>
// kernel: tpu_custom_call.1
= control target key start
LH: loop header
LB: loop body
LE: loop exit
PB: predicated region body
PF: predicated region fallthrough
CT: control target
= control target key end

     0   :  { %7 = vsyncpa [#allocation4], 0  ;;  %s1094_s0 = inlined_call_operand.hbm [shape: f32[2,64,128], index: 0, kind: input, shape index: {}]   ;;  %s1095_s1 = inlined_call_operand.vmem [shape: f32[64,8], index: 1, kind: input, shape index: {}]   ;;  %s1096_s2 = inlined_call_operand.hbm [shape: f32[2,64,128], index: 2, kind: output, shape index: {}]  }
   0x1   :  { %9 = vsyncpa [#allocation4 + $0x1], 0 }
   0x2   :  { %10 = vsyncpa [#allocation5], 0 }
   0x3   :  { %12 = vsyncpa [#allocation5 + $0x1], 0  ;;  %s779_s9 = smov 0   ;;  %s781_s10 = smov 0  }
   0x4   :  { %s783_s11 = smov 0   ;;  %s785_s12 = smov 0  }
   0x5 LB: > { %s800_s13 = sadd.s32 4294967295, %s748_s12   ;;  %s555_s14 = sadd.s32 4294967294, %s748_s12   ;;  %s748_s12 = sphi %s785_s12, %s1109_s12   ;;  %s744_s11 = sphi %s783_s11, %s1108_s11   ;;  %s740_s10 = sphi %s781_s10, %s1107_s10   ;;  %s736_s9 = sphi %s779_s9, %s1106_s9  }
   0x6   : > { %s804_s15 = sadd.s32 1, %s748_s12   ;;  %s25_s16 = sadd.s32 1, %s744_s11 }
   0x7   : > { %s22_s17 = ssub.s32 %s748_s12, %s804_s15  ;;  %p32_p0 = scmp.ne.s32.totalorder %s744_s11, %s740_s10 }
   0x8   : > { %p23_p1 = scmp.eq.s32.totalorder %s22_s17, 0  ;;  %p33_p2 = scmp.eq.s32.totalorder %s748_s12, 0 }
   0x9   : > { %p38_p3 = scmp.ne.s32.totalorder %s740_s10, %s736_s9  ;;  %p39_p4 = scmp.eq.s32.totalorder %s800_s13, 0 }
   0xa   : > { %s816_s18 = scalar_select %p23_p1, %s744_s11, %s25_s16  }
   0xb   : > { %p818_p5 = por %p33_p2, %p32_p0  ;;  %p822_p6 = por %p39_p4, %p38_p3 }
   0xc   : > { %p83_p7 = scmp.eq.s32.totalorder %s800_s13, 1  ;;  %p89_p8 = scmp.eq.s32.totalorder %s555_s14, 1 }
   0xd   : > { %p585_p10 = scmp.lt.s32.totalorder %s748_s12, 2  ;;  %s112_s23 = sand.u32 1, %s744_s11  }
   0xe   : > { %p829_p11 = por %p83_p7, %p32_p0  ;;  %p833_p12 = por %p89_p8, %p38_p3 }
   0xf   : > { %s571_s24 = sshll.u32 %s748_s12, 10  ;;  %s558_s25 = sshll.u32 %s112_s23, 6 }
  0x10   : > { %s1100_s21 = scalar_select %p829_p11, 1, 0 }
  0x11   : > { %s1101_s22 = scalar_select %p833_p12, 1, 0 }
  0x12   : > { %s842_s28 = scalar_lea.hbm %s1094_s0, %s571_s24  ;;  %s116_s29 = scalar_lea.vmem [#allocation3], %s558_s25 }
  0x13   : > { %s123_s30 = sshll.u32 %s116_s29, 4  ;;  %p846_p13 = pnand %p585_p10, %p818_p5  ;;  %s850_s30 = int_to_ptr.vmem [resolvable:$true] %s123_s30 }
  0x14   : > { %s852_s4 = scalar_lea.sflag [#allocation4], %s112_s23  ;;  %s652_s5 = scalar_lea.hbm %s842_s28, 1024 }
  0x15   : > { %p653_p0 = scmp.ne.s32.totalorder %s842_s28, %s652_s5  ;;  %p654_p1 = pneg %p846_p13 }
  0x16   : > { %s657_s8 = scalar_lea.hbm %s1094_s0, 2048  ;;  %p658_p4 = scmp.lt.u32.totalorder %s842_s28, %s1094_s0 }
  0x17   : > { %p655_p2 = pnand %p654_p1, %p653_p0  ;;  %p659_p5 = scmp.lt.u32.totalorder %s657_s8, %s652_s5 }
  0x18   : > { %p661_p8 = scmp.lt.u32.totalorder %s652_s5, %s842_s28 }
  0x19   : > { %p656_p3 = pneg %p655_p2  ;;  %p660_p7 = por %p659_p5, %p658_p4 }
  0x1b   : > { %p662_p10 = por %p661_p8, %p660_p7 }
  0x1d   : > { %p663_p9 = pnand %p662_p10, %p656_p3 }
  0x1f   : > { %666 = shalt.err (!%p663_p9)
}
  0x20   : > { %s667_s17 = scalar_lea.vmem %s850_s30, 1024  ;;  %s750_s19 = smov [#allocation3]  }
  0x21   : > { %p668_p0 = scmp.ne.s32.totalorder %s850_s30, %s667_s17  ;;  %s672_s23 = sshll.u32 %s750_s19, 4  ;;  %s673_s23 = int_to_ptr.vmem [resolvable:$false] %s672_s23 }
  0x22   : > { %s674_s24 = scalar_lea.vmem %s673_s23, 2048  ;;  %p675_p11 = scmp.lt.s32.totalorder %s850_s30, %s673_s23 }
  0x23   : > { %p670_p2 = pnand %p668_p0, %p654_p1  ;;  %p676_p4 = scmp.lt.s32.totalorder %s674_s24, %s667_s17 }
  0x25   : > { %p671_p12 = pneg %p670_p2  ;;  %p677_p5 = por %p676_p4, %p675_p11 }
  0x27   : > { %p678_p7 = pnand %p677_p5, %p671_p12 }
  0x29   : > { %681 = shalt.err (!%p678_p7)
}
  0x2a   : > { %s751_s25 = smov 128   ;;  %s752_s26 = smov 8  }
  0x2b   : > { %580 = dma.hbm_to_vmem [thread:$0]  (!%p846_p13), %s842_s28, 1024, %s850_s30, %s852_s4, %s751_s25, %s751_s25, %s752_s26  }
  0x2c   : > { %p561_p9 = scmp.ge.s32.totalorder %s748_s12, 1  ;;  %p131_p1 = scmp.lt.s32.totalorder %s748_s12, 3 }
  0x2e   : > { %p132_p3 = pnand %p561_p9, %p131_p1 }
  0x2f   : > { %s883_s27 = sand.u32 (!%p132_p3), 1, %s740_s10  }
  0x30   : > { %135 = sbr.rel (%p132_p3) target bundleno = 590 (0x24e), region = 28  ;;  %s562_s29 = sshll.u32 (!%p132_p3), %s883_s27, 6 }
  0x31   : > { %s138_s5 = scalar_lea.sflag (!%p132_p3), [#allocation4], %s883_s27  ;;  %s889_s6 = scalar_lea.vmem (!%p132_p3), [#allocation3], %s562_s29 }
  0x37   : > { %727 = dma.done.wait (%p822_p6), %s138_s5, 1024  }
  0x38   : > { %729 = vsyncadd (%p822_p6), %s138_s5, 4294966272  ;;  %v753_v0 = vmov 0   ;;  %v754_v1 = vmov 1   ;;  %v900_v2 = vld [vmem:[%s1095_s1 + $0x10] sm:$0xff]  ;;  %v170_v3 = vld [vmem:[%s889_s6] sm:$0xff]  ;;  %s755_s3 = smov 112   ;;  %v162_v7 = vlaneseq }
  0x39   : > { %631 = vset.pattern.permute.xlu1 %v753_v0  ;;  %632 = vset.pattern.permute.xlu0 %v754_v1  ;;  %v908_v4 = vld [vmem:[%s1095_s1 + $0x18] sm:$0xff]  ;;  %v174_v5 = vld [vmem:[%s889_s6 + $0x8] sm:$0xff]  ;;  %s756_s7 = smov 16   ;;  %v757_v6 = vmov 2   ;;  %v758_v9 = vmov 0.0   ;;  %v210_v11 = vld [vmem:[%s889_s6 + $0x10] sm:$0xff] }
  0x3a   : > { %226 = vperm.xlu1 %631, %v900_v2   ;;  %171 = vrot.lane.b32.xlu0 %v170_v3, %s755_s3  ;;  %v163_v8 = vand.u32 127, %v162_v7  ;;  %v211_v16 = vld [vmem:[%s889_s6 + $0x18] sm:$0xff]  ;;  %v940_v19 = vld [vmem:[%s1095_s1 + $0x28] sm:$0xff]  ;;  %v949_v21 = vld [vmem:[%s1095_s1 + $0x20] sm:$0xff]  ;;  %v759_v22 = vmov 3   ;;  %v760_v55 = vmov 4  }
  0x3b   : > { %v296_v39 = vld [vmem:[%s889_s6 + $0x20] sm:$0xff]  ;;  %v297_v48 = vld [vmem:[%s889_s6 + $0x28] sm:$0xff]  ;;  %v976_v51 = vld [vmem:[%s1095_s1 + $0x38] sm:$0xff]  ;;  %s469_s8 = scalar_lea.sflag [#allocation5], %s883_s27  ;;  %p1103_p11 = scmp.ne.s32.totalorder %s1100_s21, 0 }
  0x3c   : > { %vm164_vm0 = vcmp.lt.s32.totalorder %v163_v8, 112  ;;  %vm167_vm1 = vcmp.ge.s32.totalorder %v163_v8, 16  ;;  %v984_v52 = vld [vmem:[%s1095_s1 + $0x30] sm:$0xff]  ;;  %v183_v53 = vld [vmem:[%s1095_s1 + $0x8] sm:$0xff]  ;;  %v182_v54 = vld [vmem:[%s1095_s1] sm:$0xff] }
  0x3d   : > { %v922_v10 = vsel %vm164_vm0, 1.0, %v758_v9  ;;  %v928_v14 = vsel %vm167_vm1, 1.0, %v758_v9  ;;  %v382_v8 = vld [vmem:[%s889_s6 + $0x30] sm:$0xff] }
  0x3e   : > { %231 = vperm.xlu1 %631, %v908_v4   ;;  %175 = vrot.lane.b32.xlu0 %v174_v5, %s756_s7 }
  0x42   : > { %633 = vset.pattern.permute.xlu1 %v754_v1  ;;  %237 = vperm.xlu0 %632, %v900_v2  }
  0x43   : > { %241 = vperm.xlu1 %633, %v908_v4  }
  0x46   : > { %635 = vset.pattern.permute.xlu0 %v757_v6 }
  0x47   : > { %634 = vset.pattern.permute.xlu1 %v757_v6  ;;  %259 = vperm.xlu0 %635, %v908_v4  }
  0x48   : > { %255 = vperm.xlu1 %634, %v900_v2  }
  0x4b   : > { %638 = vset.pattern.permute.xlu0 %v754_v1 }
  0x4c   : > { %636 = vset.pattern.permute.xlu1 %v753_v0 }
  0xac   : > { %v172_v12 = vpop.permute.xlu0 %171 }
  0xad   : > { %v926_v13 = vmul.f32 %v922_v10, %v172_v12 }
  0xaf   : > { %v214_v15 = vadd.f32 %v210_v11, %v926_v13 }
  0xb0   : > { %v176_v17 = vpop.permute.xlu0 %175 }
  0xb1   : > { %v933_v18 = vmul.f32 %v928_v14, %v176_v17  ;;  %248 = vrot.lane.b32.xlu0 %v214_v15, %s755_s3  ;;  %218 = vrot.lane.b32.xlu1 %v214_v15, %s756_s7 }
  0xb3   : > { %v215_v20 = vadd.f32 %v211_v16, %v933_v18 }
  0xb5   : > { %327 = vperm.xlu0 %638, %v940_v19   ;;  %220 = vrot.lane.b32.xlu1 %v215_v20, %s756_s7 }
  0xb9   : > { %250 = vrot.lane.b32.xlu1 %v215_v20, %s755_s3  ;;  %639 = vset.pattern.permute.xlu0 %v753_v0  ;;  %v227_v23 = vpop.permute.xlu1 %226 }
  0xba   : > { %312 = vperm.xlu0 %639, %v949_v21  }
  0xbd   : > { %317 = vperm.xlu1 %636, %v940_v19   ;;  %v232_v24 = vpop.permute.xlu1 %231 }
  0xc1   : > { %637 = vset.pattern.permute.xlu1 %v754_v1  ;;  %v238_v25 = vpop.permute.xlu0 %237 }
  0xc2   : > { %323 = vperm.xlu1 %637, %v949_v21   ;;  %v242_v26 = vpop.permute.xlu1 %241  ;;  %v244_v33 = vmul.f32 %v238_v25, %v214_v15 }
  0xc3   : > { %v245_v43 = vmul.f32 %v242_v26, %v215_v20 }
  0xc6   : > { %640 = vset.pattern.permute.xlu1 %v757_v6  ;;  %v260_v28 = vpop.permute.xlu0 %259 }
  0xc7   : > { %341 = vperm.xlu1 %640, %v949_v21   ;;  %v256_v27 = vpop.permute.xlu1 %255 }
  0xcb   : > { %345 = vperm.xlu1 %640, %v940_v19  }
  0xcf   : > { %641 = vset.pattern.permute.xlu1 %v759_v22 }
 0x123   : > { %v219_v29 = vpop.permute.xlu1 %218  ;;  %v249_v30 = vpop.permute.xlu0 %248 }
 0x124   : > { %v222_v31 = vmul.f32 %v928_v14, %v219_v29  ;;  %v252_v32 = vmul.f32 %v922_v10, %v249_v30 }
 0x126   : > { %v234_v34 = vmul.f32 %v227_v23, %v222_v31  ;;  %v262_v37 = vmul.f32 %v256_v27, %v252_v32 }
 0x127   : > { %v221_v35 = vpop.permute.xlu1 %220 }
 0x128   : > { %v246_v36 = vadd.f32 %v244_v33, %v234_v34  ;;  %v223_v38 = vmul.f32 %v928_v14, %v221_v35 }
 0x12a   : > { %v963_v40 = vadd.f32 %v262_v37, %v246_v36  ;;  %v235_v41 = vmul.f32 %v232_v24, %v223_v38 }
 0x12b   : > { %v251_v42 = vpop.permute.xlu1 %250 }
 0x12c   : > { %v253_v44 = vmul.f32 %v922_v10, %v251_v42  ;;  %v300_v45 = vadd.f32 %v296_v39, %v963_v40  ;;  %v247_v46 = vadd.f32 %v245_v43, %v235_v41 }
 0x12e   : > { %v263_v47 = vmul.f32 %v260_v28, %v253_v44  ;;  %304 = vrot.lane.b32.xlu0 %v300_v45, %s756_s7 }
 0x130   : > { %v969_v49 = vadd.f32 %v263_v47, %v247_v46 }
 0x132   : > { %334 = vrot.lane.b32.xlu0 %v300_v45, %s755_s3  ;;  %v301_v50 = vadd.f32 %v297_v48, %v969_v49 }
 0x134   : > { %306 = vrot.lane.b32.xlu1 %v301_v50, %s756_s7  ;;  %v328_v57 = vpop.permute.xlu0 %327 }
 0x135   : > { %v331_v15 = vmul.f32 %v328_v57, %v301_v50 }
 0x136   : > { %403 = vperm.xlu0 %639, %v976_v51  }
 0x138   : > { %336 = vrot.lane.b32.xlu1 %v301_v50, %s755_s3 }
 0x139   : > { %v313_v59 = vpop.permute.xlu0 %312 }
 0x13a   : > { %646 = vset.pattern.permute.xlu0 %v757_v6 }
 0x13b   : > { %427 = vperm.xlu0 %646, %v984_v52  }
 0x13c   : > { %191 = vperm.xlu1 %641, %v183_v53   ;;  %v318_v56 = vpop.permute.xlu1 %317 }
 0x13f   : > { %647 = vset.pattern.permute.xlu0 %v759_v22 }
 0x140   : > { %642 = vset.pattern.permute.xlu1 %v760_v55  ;;  %186 = vperm.xlu0 %647, %v182_v54  }
 0x141   : > { %197 = vperm.xlu1 %642, %v182_v54   ;;  %v324_v58 = vpop.permute.xlu1 %323 }
 0x142   : > { %v330_v3 = vmul.f32 %v324_v58, %v300_v45 }
 0x144   : > { %358 = vperm.xlu0 %647, %v949_v21  }
 0x145   : > { %643 = vset.pattern.permute.xlu1 %v759_v22 }
 0x146   : > { %272 = vperm.xlu1 %643, %v900_v2   ;;  %v342_v60 = vpop.permute.xlu1 %341 }
 0x148   : > { %449 = vperm.xlu0 %647, %v976_v51  }
 0x14a   : > { %644 = vset.pattern.permute.xlu1 %v753_v0  ;;  %v346_v63 = vpop.permute.xlu1 %345 }
 0x14b   : > { %398 = vperm.xlu1 %644, %v984_v52  }
 0x14c   : > { %650 = vset.pattern.permute.xlu0 %v760_v55 }
 0x14d   : > { %201 = vperm.xlu0 %650, %v183_v53  }
 0x14f   : > { %645 = vset.pattern.permute.xlu1 %v754_v1 }
 0x150   : > { %409 = vperm.xlu1 %645, %v984_v52  }
 0x151   : > { %287 = vperm.xlu0 %650, %v908_v4  }
 0x154   : > { %413 = vperm.xlu1 %645, %v976_v51  }
 0x158   : > { %648 = vset.pattern.permute.xlu1 %v757_v6 }
 0x159   : > { %431 = vperm.xlu1 %648, %v976_v51  }
 0x15d   : > { %649 = vset.pattern.permute.xlu1 %v759_v22 }
 0x15e   : > { %277 = vperm.xlu1 %649, %v908_v4  }
 0x162   : > { %363 = vperm.xlu1 %649, %v940_v19  }
 0x166   : > { %444 = vperm.xlu1 %649, %v984_v52  }
 0x16a   : > { %651 = vset.pattern.permute.xlu1 %v760_v55 }
 0x16b   : > { %283 = vperm.xlu1 %651, %v900_v2  }
 0x16f   : > { %369 = vperm.xlu1 %651, %v949_v21   ;;  %v383_v21 = vld [vmem:[%s889_s6 + $0x38] sm:$0xff]  ;;  %s1026_s6 = scalar_lea.vmem [#allocation6], %s562_s29 }
 0x170   : > { %s482_s29 = sshll.u32 %s1026_s6, 4  ;;  %s1044_s29 = int_to_ptr.vmem [resolvable:$true] %s482_s29 }
 0x171   : > { %s682_s14 = scalar_lea.vmem %s1044_s29, 1024 }
 0x172   : > { %p683_p6 = scmp.ne.s32.totalorder %s1044_s29, %s682_s14 }
 0x173   : > { %373 = vperm.xlu1 %651, %v940_v19  }
 0x174   : > { %p684_p12 = pnand %p683_p6, %p1103_p11 }
 0x176   : > { %p685_p13 = pneg %p684_p12 }
 0x1a0   : > { %v305_v61 = vpop.permute.xlu0 %304 }
 0x1a1   : > { %v308_v62 = vmul.f32 %v928_v14, %v305_v61 }
 0x1a3   : > { %v320_v0 = vmul.f32 %v313_v59, %v308_v62 }
 0x1a4   : > { %v335_v1 = vpop.permute.xlu0 %334 }
 0x1a5   : > { %v338_v2 = vmul.f32 %v922_v10, %v335_v1  ;;  %v332_v5 = vadd.f32 %v330_v3, %v320_v0 }
 0x1a6   : > { %v307_v4 = vpop.permute.xlu1 %306 }
 0x1a7   : > { %v348_v6 = vmul.f32 %v342_v60, %v338_v2  ;;  %v309_v7 = vmul.f32 %v928_v14, %v307_v4 }
 0x1a9   : > { %v350_v9 = vadd.f32 %v348_v6, %v332_v5  ;;  %v321_v11 = vmul.f32 %v318_v56, %v309_v7 }
 0x1aa   : > { %v337_v12 = vpop.permute.xlu1 %336 }
 0x1ab   : > { %v339_v16 = vmul.f32 %v922_v10, %v337_v12  ;;  %v386_v17 = vadd.f32 %v382_v8, %v350_v9  ;;  %v333_v19 = vadd.f32 %v331_v15, %v321_v11 }
 0x1ad   : > { %v349_v20 = vmul.f32 %v346_v63, %v339_v16  ;;  %390 = vrot.lane.b32.xlu1 %v386_v17, %s756_s7 }
 0x1af   : > { %v351_v22 = vadd.f32 %v349_v20, %v333_v19 }
 0x1b1   : > { %420 = vrot.lane.b32.xlu1 %v386_v17, %s755_s3  ;;  %v387_v23 = vadd.f32 %v383_v21, %v351_v22 }
 0x1b3   : > { %392 = vrot.lane.b32.xlu0 %v387_v23, %s756_s7 }
 0x1b5   : > { %459 = vperm.xlu1 %651, %v976_v51   ;;  %v404_v24 = vpop.permute.xlu0 %403 }
 0x1b7   : > { %422 = vrot.lane.b32.xlu0 %v387_v23, %s755_s3  ;;  %s572_s3 = sshll.u32 %s800_s13, 10  ;;  %s761_s13 = smov [#allocation6]  }
 0x1b8   : > { %s1049_s7 = scalar_lea.hbm %s1096_s2, %s572_s3  ;;  %s686_s16 = sshll.u32 %s761_s13, 4  ;;  %s687_s16 = int_to_ptr.vmem [resolvable:$false] %s686_s16 }
 0x1b9   : > { %s688_s17 = scalar_lea.vmem %s687_s16, 2048  ;;  %p689_p8 = scmp.lt.s32.totalorder %s1044_s29, %s687_s16 }
 0x1ba   : > { %v428_v25 = vpop.permute.xlu0 %427  ;;  %p690_p10 = scmp.lt.s32.totalorder %s688_s17, %s682_s14 }
 0x1bb   : > { %455 = vperm.xlu0 %650, %v984_v52   ;;  %v192_v26 = vpop.permute.xlu1 %191 }
 0x1bc   : > { %v195_v36 = vmul.f32 %v192_v26, %v933_v18  ;;  %p691_p0 = por %p690_p10, %p689_p8 }
 0x1be   : > { %p692_p2 = pnand %p691_p0, %p685_p13 }
 0x1bf   : > { %v187_v27 = vpop.permute.xlu0 %186 }
 0x1c0   : > { %v194_v28 = vmul.f32 %v187_v27, %v926_v13  ;;  %v198_v29 = vpop.permute.xlu1 %197 }
 0x1c2   : > { %v204_v30 = vadd.f32 %v198_v29, %v194_v28 }
 0x1c3   : > { %v359_v31 = vpop.permute.xlu0 %358 }
 0x1c4   : > { %v206_v32 = vmax.f32 %v204_v30, 0.0  ;;  %v366_v55 = vmul.f32 %v359_v31, %v350_v9 }
 0x1c5   : > { %v273_v33 = vpop.permute.xlu1 %272 }
 0x1c6   : > { %208 = vst [vmem:[%s1026_s6] sm:$0xff] %v206_v32  ;;  %v280_v52 = vmul.f32 %v273_v33, %v963_v40 }
 0x1c7   : > { %v450_v34 = vpop.permute.xlu0 %449 }
 0x1ca   : > { %v399_v35 = vpop.permute.xlu1 %398 }
 0x1cc   : > { %v202_v37 = vpop.permute.xlu0 %201 }
 0x1cd   : > { %v205_v38 = vadd.f32 %v202_v37, %v195_v36 }
 0x1cf   : > { %v207_v39 = vmax.f32 %v205_v38, 0.0  ;;  %v410_v13 = vpop.permute.xlu1 %409 }
 0x1d0   : > { %v416_v41 = vmul.f32 %v410_v13, %v386_v17  ;;  %v288_v46 = vpop.permute.xlu0 %287 }
 0x1d1   : > { %209 = vst [vmem:[%s1026_s6 + $0x8] sm:$0xff] %v207_v39 }
 0x1d3   : > { %v414_v42 = vpop.permute.xlu1 %413 }
 0x1d4   : > { %v417_v43 = vmul.f32 %v414_v42, %v387_v23 }
 0x1d8   : > { %v432_v44 = vpop.permute.xlu1 %431 }
 0x1dd   : > { %v278_v45 = vpop.permute.xlu1 %277 }
 0x1de   : > { %v281_v47 = vmul.f32 %v278_v45, %v969_v49 }
 0x1e0   : > { %v291_v48 = vadd.f32 %v288_v46, %v281_v47 }
 0x1e1   : > { %v364_v50 = vpop.permute.xlu1 %363 }
 0x1e2   : > { %v293_v51 = vmax.f32 %v291_v48, 0.0  ;;  %v367_v59 = vmul.f32 %v364_v50, %v351_v22 }
 0x1e4   : > { %295 = vst [vmem:[%s1026_s6 + $0x18] sm:$0xff] %v293_v51 }
 0x1e5   : > { %v445_v18 = vpop.permute.xlu1 %444 }
 0x1ea   : > { %v284_v53 = vpop.permute.xlu1 %283 }
 0x1eb   : > { %v290_v54 = vadd.f32 %v284_v53, %v280_v52 }
 0x1ed   : > { %v292_v56 = vmax.f32 %v290_v54, 0.0 }
 0x1ee   : > { %v370_v57 = vpop.permute.xlu1 %369 }
 0x1ef   : > { %294 = vst [vmem:[%s1026_s6 + $0x10] sm:$0xff] %v292_v56  ;;  %v376_v58 = vadd.f32 %v370_v57, %v366_v55 }
 0x1f1   : > { %v378_v60 = vmax.f32 %v376_v58, 0.0 }
 0x1f2   : > { %v374_v61 = vpop.permute.xlu1 %373 }
 0x1f3   : > { %380 = vst [vmem:[%s1026_s6 + $0x20] sm:$0xff] %v378_v60  ;;  %v377_v49 = vadd.f32 %v374_v61, %v367_v59 }
 0x1f5   : > { %v379_v62 = vmax.f32 %v377_v49, 0.0 }
 0x1f7   : > { %381 = vst [vmem:[%s1026_s6 + $0x28] sm:$0xff] %v379_v62 }
 0x21f   : > { %v391_v63 = vpop.permute.xlu1 %390 }
 0x220   : > { %v394_v0 = vmul.f32 %v928_v14, %v391_v63 }
 0x222   : > { %v406_v1 = vmul.f32 %v399_v35, %v394_v0 }
 0x223   : > { %v421_v3 = vpop.permute.xlu1 %420 }
 0x224   : > { %v424_v40 = vmul.f32 %v922_v10, %v421_v3  ;;  %v418_v4 = vadd.f32 %v416_v41, %v406_v1 }
 0x225   : > { %v393_v2 = vpop.permute.xlu0 %392 }
 0x226   : > { %v434_v5 = vmul.f32 %v428_v25, %v424_v40  ;;  %v395_v6 = vmul.f32 %v928_v14, %v393_v2 }
 0x228   : > { %v436_v7 = vadd.f32 %v434_v5, %v418_v4  ;;  %v407_v8 = vmul.f32 %v404_v24, %v395_v6 }
 0x229   : > { %v423_v9 = vpop.permute.xlu0 %422 }
 0x22a   : > { %v425_v11 = vmul.f32 %v922_v10, %v423_v9  ;;  %v452_v12 = vmul.f32 %v445_v18, %v436_v7  ;;  %v419_v16 = vadd.f32 %v417_v43, %v407_v8 }
 0x22c   : > { %v435_v15 = vmul.f32 %v432_v44, %v425_v11 }
 0x22e   : > { %v437_v17 = vadd.f32 %v435_v15, %v419_v16 }
 0x230   : > { %v453_v19 = vmul.f32 %v450_v34, %v437_v17 }
 0x234   : > { %v460_v20 = vpop.permute.xlu1 %459 }
 0x235   : > { %v463_v21 = vadd.f32 %v460_v20, %v453_v19 }
 0x237   : > { %v465_v22 = vmax.f32 %v463_v21, 0.0 }
 0x239   : > { %467 = vst [vmem:[%s1026_s6 + $0x38] sm:$0xff] %v465_v22 }
 0x23a   : > { %v456_v14 = vpop.permute.xlu0 %455 }
 0x23b   : > { %v462_v10 = vadd.f32 %v456_v14, %v452_v12 }
 0x23d   : > { %v464_v23 = vmax.f32 %v462_v10, 0.0 }
 0x23f   : > { %466 = vst [vmem:[%s1026_s6 + $0x30] sm:$0xff] %v464_v23 }
 0x240   : > { %695 = shalt.err (!%p692_p2)
}
 0x241   : > { %s696_s19 = scalar_lea.hbm %s1049_s7, 1024  ;;  %s700_s25 = scalar_lea.hbm %s1096_s2, 2048 }
 0x242   : > { %p697_p4 = scmp.ne.s32.totalorder %s1049_s7, %s696_s19  ;;  %p701_p9 = scmp.lt.u32.totalorder %s1049_s7, %s1096_s2 }
 0x243   : > { %p702_p1 = scmp.lt.u32.totalorder %s700_s25, %s696_s19  ;;  %p704_p6 = scmp.lt.u32.totalorder %s696_s19, %s1049_s7 }
 0x244   : > { %p698_p5 = pnand %p697_p4, %p1103_p11 }
 0x245   : > { %p703_p3 = por %p702_p1, %p701_p9 }
 0x246   : > { %p699_p7 = pneg %p698_p5 }
 0x247   : > { %p705_p12 = por %p704_p6, %p703_p3 }
 0x249   : > { %p706_p13 = pnand %p705_p12, %p699_p7 }
 0x24b   : > { %709 = shalt.err (!%p706_p13)
}
 0x24c   : > { %s762_s28 = smov 128   ;;  %s763_s30 = smov 8  }
 0x24d   : > { %575 = dma.vmem_to_hbm [thread:$0]  (%p1103_p11), %s1044_s29, 1024, %s1049_s7, %s469_s8, %s762_s28, %s762_s28, %s763_s30  }
 0x24e PF: > { %s497_s6 = sand.u32 1, %s736_s9   ;;  %p1104_p8 = scmp.ne.s32.totalorder %s1101_s22, 0 }
 0x24f   : > { %p1105_p10 = scmp.ge.s32.totalorder %s748_s12, 2  ;;  %s498_s3 = scalar_lea.sflag [#allocation5], %s497_s6 }
 0x251   : > { %p582_p0 = pnand %p1105_p10, %p1104_p8 }
 0x253   : > { %731 = dma.done.wait (!%p582_p0), %s498_s3, 1024  }
 0x254   : > { %733 = vsyncadd (!%p582_p0), %s498_s3, 4294966272  ;;  %p15_p2 = scmp.ge.s32.totalorder %s804_s15, 4   ;;  %s1106_s9 = smov %s740_s10 }
 0x255   : > { %s1107_s10 = smov %s744_s11  ;;  %s1108_s11 = smov %s816_s18 }
 0x256   : > { %s1109_s12 = smov %s804_s15  ;;  %17 = sbr.rel (!%p15_p2) target bundleno = 5 (0x5), region = 73 }
 0x25d   :  { %503 = vsyncpa [#allocation4], 1 }
 0x25e   :  { %505 = vsyncpa [#allocation4 + $0x1], 1 }
 0x25f   :  { %506 = vsyncpa [#allocation5], 1 }
 0x260   :  { %508 = vsyncpa [#allocation5 + $0x1], 1 }

</bundles_post_ra>
